<compile_context>
chip_gen: v7x
topology: tpu7x:2x2x1
jax: 0.10.0
libtpu: 0.0.40
codegen_flags: <defaults>
</compile_context>

<pallas_src>
import math
import numpy as np

import jax
import jax.numpy as jnp
from jax.experimental import pallas as pl
from jax.experimental.pallas import tpu as pltpu


# ----------------------------------------------------------------------------
# Helpers (plain JAX / numpy glue)
# ----------------------------------------------------------------------------
def idct_matrix(n: int) -> jnp.ndarray:
    """Ortho-normalized DCT-III (inverse DCT) matrix M s.t. idct(v) = M @ v."""
    k = np.arange(n)[None, :]
    m = np.arange(n)[:, None]
    M = np.sqrt(2.0 / n) * np.cos(np.pi * (m + 0.5) * k / n)
    M[:, 0] = 1.0 / np.sqrt(n)
    return jnp.asarray(M, dtype=jnp.float32)


def get_sparse_config(in_dim: int, out_dim: int, sparsity_level: float):
    """Mirror of LowFreqDctLSTM.get_sparse_config (num coeffs, num diags)."""
    total_el = in_dim * out_dim
    thr = int(total_el * (1 - sparsity_level))
    non_zeros = total_el
    num_diag = 0
    for num_diag in range(out_dim):
        non_zeros = np.tril_indices(out_dim, -num_diag, in_dim)[0].size
        if non_zeros < thr:
            break
    return non_zeros, num_diag


def build_flipped_sparse_T(coeffs_list, rows, cols, shape):
    """Per gate: A = fliplr(scatter(coeffs));  returns stack of A^T: [4, C, R]."""
    mats = []
    for cvec in coeffs_list:
        a = jnp.zeros(shape, jnp.float32).at[rows, cols].set(cvec)
        mats.append(jnp.transpose(jnp.fliplr(a)))   # fliplr BEFORE idct (torch)
    return jnp.stack(mats, axis=0)


# ----------------------------------------------------------------------------
# Kernel 1: weight generation.  One invocation produces both transposed weight
# matrices, lane-dense (last dim = 4H):
#   W_ih^T[:, gH:(g+1)H] = M_in  @ A_ih_g^T @ M_hid^T      (D, H)
#   W_hh^T[:, gH:(g+1)H] = M_hid @ A_hh_g^T @ M_hid^T      (H, H)
# (equivalent to W_g = M_hid @ A_g @ M_in^T in the torch module)
# ----------------------------------------------------------------------------
def _gen_weights_kernel(a_ih_t_ref, a_hh_t_ref, m_in_ref, m_hid_ref,
                        m_hid_t_ref, wih_t_ref, whh_t_ref):
    H = a_ih_t_ref.shape[2]
    m_in = m_in_ref[...]
    m_hid = m_hid_ref[...]
    m_hid_t = m_hid_t_ref[...]
    for g in range(4):                                   # unrolled, runs once
        t_ih = jnp.dot(m_in, a_ih_t_ref[g], preferred_element_type=jnp.float32)
        wih_t_ref[:, g * H:(g + 1) * H] = jnp.dot(
            t_ih, m_hid_t, preferred_element_type=jnp.float32)
        t_hh = jnp.dot(m_hid, a_hh_t_ref[g], preferred_element_type=jnp.float32)
        whh_t_ref[:, g * H:(g + 1) * H] = jnp.dot(
            t_hh, m_hid_t, preferred_element_type=jnp.float32)


def gen_weights_pallas(a_ih_t, a_hh_t, m_in, m_hid):
    """a_ih_t: [4, D, H]; a_hh_t: [4, H, H] -> (W_ih^T [D,4H], W_hh^T [H,4H])."""
    _, D, H = a_ih_t.shape
    m_hid_t = jnp.transpose(m_hid)
    return pl.pallas_call(
        _gen_weights_kernel,
        out_shape=(jax.ShapeDtypeStruct((D, 4 * H), jnp.float32),
                   jax.ShapeDtypeStruct((H, 4 * H), jnp.float32)),
        grid=(1,),
        in_specs=[
            pl.BlockSpec((4, D, H), lambda i: (0, 0, 0)),
            pl.BlockSpec((4, H, H), lambda i: (0, 0, 0)),
            pl.BlockSpec((D, D), lambda i: (0, 0)),
            pl.BlockSpec((H, H), lambda i: (0, 0)),
            pl.BlockSpec((H, H), lambda i: (0, 0)),
        ],
        out_specs=(pl.BlockSpec((D, 4 * H), lambda i: (0, 0)),
                   pl.BlockSpec((H, 4 * H), lambda i: (0, 0))),
        compiler_params=pltpu.CompilerParams(
            dimension_semantics=("arbitrary",)),
    )(a_ih_t, a_hh_t, m_in, m_hid, m_hid_t)


# ----------------------------------------------------------------------------
# Kernel 2: input projection, hoisted out of the recurrence.
#   gates_x = x[T*B, D] (bf16) @ W_ih^T (bf16) + bias   -> f32 [T*B, 4H]
# ----------------------------------------------------------------------------
def _input_proj_kernel(x_ref, wih_t_ref, bias_ref, gx_ref):
    gx_ref[...] = (jnp.dot(x_ref[...], wih_t_ref[...],
                           preferred_element_type=jnp.float32)
                   + bias_ref[...])


def input_projection_pallas(x_seq, wih_t_bf16, bias):
    T, B, D = x_seq.shape
    H4 = wih_t_bf16.shape[1]
    TB = T * B
    x_flat = x_seq.reshape(TB, D).astype(jnp.bfloat16)
    bias2d = bias.reshape(1, H4).astype(jnp.float32)

    rb = min(TB, 256)                 # row tile; TB is small in the demo
    if TB % rb != 0:
        rb = TB

    gx = pl.pallas_call(
        _input_proj_kernel,
        out_shape=jax.ShapeDtypeStruct((TB, H4), jnp.float32),
        grid=(TB // rb,),
        in_specs=[
            pl.BlockSpec((rb, D), lambda r: (r, 0)),
            pl.BlockSpec((D, H4), lambda r: (0, 0)),
            pl.BlockSpec((1, H4), lambda r: (0, 0)),
        ],
        out_specs=pl.BlockSpec((rb, H4), lambda r: (r, 0)),
        compiler_params=pltpu.CompilerParams(
            dimension_semantics=("parallel",)),
    )(x_flat, wih_t_bf16, bias2d)
    return gx.reshape(T, B, H4)


# ----------------------------------------------------------------------------
# Kernel 3: LSTM recurrence.  Whole time chunk per grid step; only the hidden
# matmul is on the serial path.  Gate order matches torch.split:
#   [candidate (tanh), i, f, o].
# ----------------------------------------------------------------------------
def _lstm_recurrence_kernel(gx_ref, whh_t_ref, out_ref, c_out_ref,
                            h_scr, c_scr):
    t_chunk = pl.program_id(1)
    n_chunks = pl.num_programs(1)
    Tc, bb, H4 = gx_ref.shape
    H = whh_t_ref.shape[0]

    @pl.when(t_chunk == 0)
    def _():
        h_scr[...] = jnp.zeros_like(h_scr)
        c_scr[...] = jnp.zeros_like(c_scr)

    whh_t = whh_t_ref[...]                                  # (H, 4H) bf16
    # Lane mask hoisted out of the time loop (JAX does not CSE broadcasts):
    # lanes [0, H) are the tanh candidate, the rest are sigmoid gates.
    lane = jax.lax.broadcasted_iota(jnp.int32, (bb, H4), dimension=1)
    is_cand = lane < H

    def step(t, carry):
        h, c = carry                                        # f32 (bb, H)
        gates = gx_ref[t] + jnp.dot(h.astype(jnp.bfloat16), whh_t,
                                    preferred_element_type=jnp.float32)
        # Fused activation over the full (bb, 4H) vreg:
        #   sigmoid(x) = 0.5 * tanh(0.5 * x) + 0.5   -> a single tanh pass.
        pre = jnp.where(is_cand, gates, 0.5 * gates)
        th = jnp.tanh(pre)
        act = jnp.where(is_cand, th, 0.5 * th + 0.5)

        g = act[:, 0:H]
        i = act[:, H:2 * H]
        f = act[:, 2 * H:3 * H]
        o = act[:, 3 * H:4 * H]

        c_new = i * g + f * c
        h_new = o * jnp.tanh(c_new)
        out_ref[t] = h_new.astype(out_ref.dtype)
        return (h_new, c_new)

    h_fin, c_fin = jax.lax.fori_loop(0, Tc, step, (h_scr[...], c_scr[...]),
                                     unroll=True)
    h_scr[...] = h_fin
    c_scr[...] = c_fin

    @pl.when(t_chunk == n_chunks - 1)
    def _():
        c_out_ref[...] = c_fin


def lstm_pallas(gates_x, whh_t_bf16, *, time_chunk=None, batch_block=None):
    """gates_x: [T, B, 4H] f32 (already includes x @ W_ih^T + bias)."""
    T, B, H4 = gates_x.shape
    H = H4 // 4
    Tc = time_chunk if time_chunk is not None else T
    bb = batch_block if batch_block is not None else B
    assert T % Tc == 0 and B % bb == 0

    outputs, c_final = pl.pallas_call(
        _lstm_recurrence_kernel,
        out_shape=(jax.ShapeDtypeStruct((T, B, H), jnp.float32),
                   jax.ShapeDtypeStruct((B, H), jnp.float32)),
        grid=(B // bb, T // Tc),
        in_specs=[
            pl.BlockSpec((Tc, bb, H4), lambda b, t: (t, b, 0)),
            pl.BlockSpec((H, H4), lambda b, t: (0, 0)),
        ],
        out_specs=(pl.BlockSpec((Tc, bb, H), lambda b, t: (t, b, 0)),
                   pl.BlockSpec((bb, H), lambda b, t: (b, 0))),
        scratch_shapes=[pltpu.VMEM((bb, H), jnp.float32),
                        pltpu.VMEM((bb, H), jnp.float32)],
        compiler_params=pltpu.CompilerParams(
            dimension_semantics=("parallel", "arbitrary")),
    )(gates_x, whh_t_bf16)
    return outputs, c_final


# ----------------------------------------------------------------------------
# Full forward (weight generation + input projection + recurrence)
# ----------------------------------------------------------------------------
def low_freq_dct_lstm_forward(x_seq, params, input_dim, hidden_dim,
                              in_num_diags, hid_num_diags):
    H, D = hidden_dim, input_dim
    M_in = idct_matrix(D)
    M_hid = idct_matrix(H)

    rows_ih, cols_ih = np.tril_indices(H, -in_num_diags, D)
    rows_hh, cols_hh = np.tril_indices(H, -hid_num_diags, H)

    A_ih_T = build_flipped_sparse_T(params["in_coeffs"], rows_ih, cols_ih,
                                    (H, D))                  # [4, D, H]
    A_hh_T = build_flipped_sparse_T(params["hid_coeffs"], rows_hh, cols_hh,
                                    (H, H))                  # [4, H, H]

    W_ih_T, W_hh_T = gen_weights_pallas(A_ih_T, A_hh_T, M_in, M_hid)

    # bf16 weights for the MXU (f32 accumulation, f32 elementwise math).
    wih_t_bf = W_ih_T.astype(jnp.bfloat16)                   # (D, 4H)
    whh_t_bf = W_hh_T.astype(jnp.bfloat16)                   # (H, 4H)

    # TODO(synk): weight_drop / dropout_dct are eval-mode identity here.
    gates_x = input_projection_pallas(x_seq, wih_t_bf, params["bias"])
    outputs, c_final = lstm_pallas(gates_x, whh_t_bf)
    h_final = outputs[-1]
    # torch returns (squeeze(stack(outputs)), (h_last, c_last)); squeeze is a
    # no-op for T,B,H > 1.
    return outputs, (h_final, c_final), (wih_t_bf, whh_t_bf)


# ----------------------------------------------------------------------------
# Pure-JAX reference for validation (same bf16-cast operands as the kernels)
# ----------------------------------------------------------------------------
def reference_lstm(x_seq, wih_t, whh_t, bias):
    T, B, D = x_seq.shape
    H = whh_t.shape[0]
    gx = (jnp.dot(x_seq.reshape(T * B, D).astype(jnp.bfloat16), wih_t,
                  preferred_element_type=jnp.float32)
          + bias.astype(jnp.float32)).reshape(T, B, 4 * H)
    h = jnp.zeros((B, H), jnp.float32)
    c = jnp.zeros((B, H), jnp.float32)
    outs = []
    for t in range(T):
        gates = gx[t] + jnp.dot(h.astype(jnp.bfloat16), whh_t,
                                preferred_element_type=jnp.float32)
        g = jnp.tanh(gates[:, :H])
        i = jax.nn.sigmoid(gates[:, H:2 * H])
        f = jax.nn.sigmoid(gates[:, 2 * H:3 * H])
        o = jax.nn.sigmoid(gates[:, 3 * H:])
        c = i * g + f * c
        h = o * jnp.tanh(c)
        outs.append(h)
    return jnp.stack(outs), (h, c)


# ----------------------------------------------------------------------------
if __name__ == "__main__":
    # Small shapes consistent with the module.
    T, B = 8, 8
    input_dim, hidden_dim = 32, 32
    sparsity_ih, sparsity_hh = 0.5, 0.5

    in_coeffs_dim, in_num_diags = get_sparse_config(input_dim, hidden_dim,
                                                    sparsity_ih)
    hid_coeffs_dim, hid_num_diags = get_sparse_config(hidden_dim, hidden_dim,
                                                      sparsity_hh)

    key = jax.random.PRNGKey(0)
    keys = jax.random.split(key, 10)
    initrange = 1.0 / math.sqrt(hidden_dim)

    # Deterministic synthetic parameters (same shapes as the nn.Parameters).
    # TODO(synk): the torch init runs dct_2d on a random matrix before slicing
    # coefficients; values here are just deterministic uniforms (same shape).
    in_coeffs = [jax.random.uniform(keys[i], (in_coeffs_dim,),
                                    minval=-initrange, maxval=initrange,
                                    dtype=jnp.float32) for i in range(4)]
    hid_coeffs = [jax.random.uniform(keys[4 + i], (hid_coeffs_dim,),
                                     minval=-initrange, maxval=initrange,
                                     dtype=jnp.float32) for i in range(4)]
    bias = jax.random.uniform(keys[8], (4 * hidden_dim,),
                              minval=-initrange, maxval=initrange,
                              dtype=jnp.float32)
    params = {"in_coeffs": in_coeffs, "hid_coeffs": hid_coeffs, "bias": bias}

    x_seq = jax.random.normal(keys[9], (T, B, input_dim), dtype=jnp.float32)

    outputs, (h_fin, c_fin), (W_ih_T, W_hh_T) = low_freq_dct_lstm_forward(
        x_seq, params, input_dim, hidden_dim, in_num_diags, hid_num_diags)
    jax.block_until_ready(outputs)
    jax.block_until_ready(c_fin)

    # Sanity-check against a pure-JAX reference using the same generated
    # (bf16-cast) weights — validates the Pallas chain end-to-end.
    ref_out, (ref_h, ref_c) = reference_lstm(x_seq, W_ih_T, W_hh_T, bias)
    assert outputs.shape == (T, B, hidden_dim)
    assert h_fin.shape == (B, hidden_dim) and c_fin.shape == (B, hidden_dim)
    np.testing.assert_allclose(np.asarray(outputs), np.asarray(ref_out),
                               rtol=1e-2, atol=1e-2)
    np.testing.assert_allclose(np.asarray(c_fin), np.asarray(ref_c),
                               rtol=1e-2, atol=1e-2)
    np.testing.assert_allclose(np.asarray(h_fin), np.asarray(ref_h),
                               rtol=1e-2, atol=1e-2)

    print("KERNEL_OK")
</pallas_src>

<mosaic_0001>
module attributes {stable_mosaic.version = 11 : i64} {
  func.func @_gen_weights_kernel(%arg0: i32, %arg1: memref<4x32x32xf32, #tpu.memory_space<vmem>>, %arg2: memref<4x32x32xf32, #tpu.memory_space<vmem>>, %arg3: memref<32x32xf32, #tpu.memory_space<vmem>>, %arg4: memref<32x32xf32, #tpu.memory_space<vmem>>, %arg5: memref<32x32xf32, #tpu.memory_space<vmem>>, %arg6: memref<32x128xf32, #tpu.memory_space<vmem>>, %arg7: memref<32x128xf32, #tpu.memory_space<vmem>>) attributes {dimension_semantics = [#tpu.dimension_semantics<arbitrary>], iteration_bounds = array<i64: 1>, scalar_prefetch = 0 : i64, scratch_operands = 0 : i64, tpu.core_type = #tpu.core_type<tc>, window_params = [{pipeline_mode = #tpu.pipeline_mode<synchronous>, transform_indices = @transform_0, window_bounds = array<i64: 4, 32, 32>}, {pipeline_mode = #tpu.pipeline_mode<synchronous>, transform_indices = @transform_1, window_bounds = array<i64: 4, 32, 32>}, {pipeline_mode = #tpu.pipeline_mode<synchronous>, transform_indices = @transform_2, window_bounds = array<i64: 32, 32>}, {pipeline_mode = #tpu.pipeline_mode<synchronous>, transform_indices = @transform_3, window_bounds = array<i64: 32, 32>}, {pipeline_mode = #tpu.pipeline_mode<synchronous>, transform_indices = @transform_4, window_bounds = array<i64: 32, 32>}, {pipeline_mode = #tpu.pipeline_mode<synchronous>, transform_indices = @transform_5, window_bounds = array<i64: 32, 128>}, {pipeline_mode = #tpu.pipeline_mode<synchronous>, transform_indices = @transform_6, window_bounds = array<i64: 32, 128>}]} {
    %c0 = arith.constant 0 : index
    %c0_0 = arith.constant 0 : index
    %0 = vector.load %arg3[%c0, %c0_0] : memref<32x32xf32, #tpu.memory_space<vmem>>, vector<32x32xf32>
    %c0_1 = arith.constant 0 : index
    %c0_2 = arith.constant 0 : index
    %1 = vector.load %arg4[%c0_1, %c0_2] : memref<32x32xf32, #tpu.memory_space<vmem>>, vector<32x32xf32>
    %c0_3 = arith.constant 0 : index
    %c0_4 = arith.constant 0 : index
    %2 = vector.load %arg5[%c0_3, %c0_4] : memref<32x32xf32, #tpu.memory_space<vmem>>, vector<32x32xf32>
    %c0_5 = arith.constant 0 : index
    %c0_6 = arith.constant 0 : index
    %c0_7 = arith.constant 0 : index
    %3 = vector.load %arg1[%c0_5, %c0_6, %c0_7] : memref<4x32x32xf32, #tpu.memory_space<vmem>>, vector<1x32x32xf32>
    %4 = vector.shape_cast %3 : vector<1x32x32xf32> to vector<32x32xf32>
    %cst = arith.constant dense<0.000000e+00> : vector<32x32xf32>
    %5 = tpu.matmul %0, %4, %cst {dimension_numbers = #tpu.dot_dimension_numbers<[1], [0], [0], [1], [0, 0, 1, 1], [], []>} : vector<32x32xf32>, vector<32x32xf32>, vector<32x32xf32> -> vector<32x32xf32>
    %cst_8 = arith.constant dense<0.000000e+00> : vector<32x32xf32>
    %6 = tpu.matmul %5, %2, %cst_8 {dimension_numbers = #tpu.dot_dimension_numbers<[1], [0], [0], [1], [0, 0, 1, 1], [], []>} : vector<32x32xf32>, vector<32x32xf32>, vector<32x32xf32> -> vector<32x32xf32>
    %c0_9 = arith.constant 0 : index
    %c0_10 = arith.constant 0 : index
    %7 = vector.load %arg6[%c0_9, %c0_10] : memref<32x128xf32, #tpu.memory_space<vmem>>, vector<32x32xf32>
    tpu.vector_store %arg6[%c0_9, %c0_10], %6 {strides = array<i32>} : memref<32x128xf32, #tpu.memory_space<vmem>>, vector<32x32xf32>,
    %c0_11 = arith.constant 0 : index
    %c0_12 = arith.constant 0 : index
    %c0_13 = arith.constant 0 : index
    %8 = vector.load %arg2[%c0_11, %c0_12, %c0_13] : memref<4x32x32xf32, #tpu.memory_space<vmem>>, vector<1x32x32xf32>
    %9 = vector.shape_cast %8 : vector<1x32x32xf32> to vector<32x32xf32>
    %cst_14 = arith.constant dense<0.000000e+00> : vector<32x32xf32>
    %10 = tpu.matmul %1, %9, %cst_14 {dimension_numbers = #tpu.dot_dimension_numbers<[1], [0], [0], [1], [0, 0, 1, 1], [], []>} : vector<32x32xf32>, vector<32x32xf32>, vector<32x32xf32> -> vector<32x32xf32>
    %cst_15 = arith.constant dense<0.000000e+00> : vector<32x32xf32>
    %11 = tpu.matmul %10, %2, %cst_15 {dimension_numbers = #tpu.dot_dimension_numbers<[1], [0], [0], [1], [0, 0, 1, 1], [], []>} : vector<32x32xf32>, vector<32x32xf32>, vector<32x32xf32> -> vector<32x32xf32>
    %c0_16 = arith.constant 0 : index
    %c0_17 = arith.constant 0 : index
    %12 = vector.load %arg7[%c0_16, %c0_17] : memref<32x128xf32, #tpu.memory_space<vmem>>, vector<32x32xf32>
    tpu.vector_store %arg7[%c0_16, %c0_17], %11 {strides = array<i32>} : memref<32x128xf32, #tpu.memory_space<vmem>>, vector<32x32xf32>,
    %c1 = arith.constant 1 : index
    %c0_18 = arith.constant 0 : index
    %c0_19 = arith.constant 0 : index
    %13 = vector.load %arg1[%c1, %c0_18, %c0_19] : memref<4x32x32xf32, #tpu.memory_space<vmem>>, vector<1x32x32xf32>
    %14 = vector.shape_cast %13 : vector<1x32x32xf32> to vector<32x32xf32>
    %cst_20 = arith.constant dense<0.000000e+00> : vector<32x32xf32>
    %15 = tpu.matmul %0, %14, %cst_20 {dimension_numbers = #tpu.dot_dimension_numbers<[1], [0], [0], [1], [0, 0, 1, 1], [], []>} : vector<32x32xf32>, vector<32x32xf32>, vector<32x32xf32> -> vector<32x32xf32>
    %cst_21 = arith.constant dense<0.000000e+00> : vector<32x32xf32>
    %16 = tpu.matmul %15, %2, %cst_21 {dimension_numbers = #tpu.dot_dimension_numbers<[1], [0], [0], [1], [0, 0, 1, 1], [], []>} : vector<32x32xf32>, vector<32x32xf32>, vector<32x32xf32> -> vector<32x32xf32>
    %c0_22 = arith.constant 0 : index
    %c32 = arith.constant 32 : index
    %17 = vector.load %arg6[%c0_22, %c32] : memref<32x128xf32, #tpu.memory_space<vmem>>, vector<32x32xf32>
    tpu.vector_store %arg6[%c0_22, %c32], %16 {strides = array<i32>} : memref<32x128xf32, #tpu.memory_space<vmem>>, vector<32x32xf32>,
    %c1_23 = arith.constant 1 : index
    %c0_24 = arith.constant 0 : index
    %c0_25 = arith.constant 0 : index
    %18 = vector.load %arg2[%c1_23, %c0_24, %c0_25] : memref<4x32x32xf32, #tpu.memory_space<vmem>>, vector<1x32x32xf32>
    %19 = vector.shape_cast %18 : vector<1x32x32xf32> to vector<32x32xf32>
    %cst_26 = arith.constant dense<0.000000e+00> : vector<32x32xf32>
    %20 = tpu.matmul %1, %19, %cst_26 {dimension_numbers = #tpu.dot_dimension_numbers<[1], [0], [0], [1], [0, 0, 1, 1], [], []>} : vector<32x32xf32>, vector<32x32xf32>, vector<32x32xf32> -> vector<32x32xf32>
    %cst_27 = arith.constant dense<0.000000e+00> : vector<32x32xf32>
    %21 = tpu.matmul %20, %2, %cst_27 {dimension_numbers = #tpu.dot_dimension_numbers<[1], [0], [0], [1], [0, 0, 1, 1], [], []>} : vector<32x32xf32>, vector<32x32xf32>, vector<32x32xf32> -> vector<32x32xf32>
    %c0_28 = arith.constant 0 : index
    %c32_29 = arith.constant 32 : index
    %22 = vector.load %arg7[%c0_28, %c32_29] : memref<32x128xf32, #tpu.memory_space<vmem>>, vector<32x32xf32>
    tpu.vector_store %arg7[%c0_28, %c32_29], %21 {strides = array<i32>} : memref<32x128xf32, #tpu.memory_space<vmem>>, vector<32x32xf32>,
    %c2 = arith.constant 2 : index
    %c0_30 = arith.constant 0 : index
    %c0_31 = arith.constant 0 : index
    %23 = vector.load %arg1[%c2, %c0_30, %c0_31] : memref<4x32x32xf32, #tpu.memory_space<vmem>>, vector<1x32x32xf32>
    %24 = vector.shape_cast %23 : vector<1x32x32xf32> to vector<32x32xf32>
    %cst_32 = arith.constant dense<0.000000e+00> : vector<32x32xf32>
    %25 = tpu.matmul %0, %24, %cst_32 {dimension_numbers = #tpu.dot_dimension_numbers<[1], [0], [0], [1], [0, 0, 1, 1], [], []>} : vector<32x32xf32>, vector<32x32xf32>, vector<32x32xf32> -> vector<32x32xf32>
    %cst_33 = arith.constant dense<0.000000e+00> : vector<32x32xf32>
    %26 = tpu.matmul %25, %2, %cst_33 {dimension_numbers = #tpu.dot_dimension_numbers<[1], [0], [0], [1], [0, 0, 1, 1], [], []>} : vector<32x32xf32>, vector<32x32xf32>, vector<32x32xf32> -> vector<32x32xf32>
    %c0_34 = arith.constant 0 : index
    %c64 = arith.constant 64 : index
    %27 = vector.load %arg6[%c0_34, %c64] : memref<32x128xf32, #tpu.memory_space<vmem>>, vector<32x32xf32>
    tpu.vector_store %arg6[%c0_34, %c64], %26 {strides = array<i32>} : memref<32x128xf32, #tpu.memory_space<vmem>>, vector<32x32xf32>,
    %c2_35 = arith.constant 2 : index
    %c0_36 = arith.constant 0 : index
    %c0_37 = arith.constant 0 : index
    %28 = vector.load %arg2[%c2_35, %c0_36, %c0_37] : memref<4x32x32xf32, #tpu.memory_space<vmem>>, vector<1x32x32xf32>
    %29 = vector.shape_cast %28 : vector<1x32x32xf32> to vector<32x32xf32>
    %cst_38 = arith.constant dense<0.000000e+00> : vector<32x32xf32>
    %30 = tpu.matmul %1, %29, %cst_38 {dimension_numbers = #tpu.dot_dimension_numbers<[1], [0], [0], [1], [0, 0, 1, 1], [], []>} : vector<32x32xf32>, vector<32x32xf32>, vector<32x32xf32> -> vector<32x32xf32>
    %cst_39 = arith.constant dense<0.000000e+00> : vector<32x32xf32>
    %31 = tpu.matmul %30, %2, %cst_39 {dimension_numbers = #tpu.dot_dimension_numbers<[1], [0], [0], [1], [0, 0, 1, 1], [], []>} : vector<32x32xf32>, vector<32x32xf32>, vector<32x32xf32> -> vector<32x32xf32>
    %c0_40 = arith.constant 0 : index
    %c64_41 = arith.constant 64 : index
    %32 = vector.load %arg7[%c0_40, %c64_41] : memref<32x128xf32, #tpu.memory_space<vmem>>, vector<32x32xf32>
    tpu.vector_store %arg7[%c0_40, %c64_41], %31 {strides = array<i32>} : memref<32x128xf32, #tpu.memory_space<vmem>>, vector<32x32xf32>,
    %c3 = arith.constant 3 : index
    %c0_42 = arith.constant 0 : index
    %c0_43 = arith.constant 0 : index
    %33 = vector.load %arg1[%c3, %c0_42, %c0_43] : memref<4x32x32xf32, #tpu.memory_space<vmem>>, vector<1x32x32xf32>
    %34 = vector.shape_cast %33 : vector<1x32x32xf32> to vector<32x32xf32>
    %cst_44 = arith.constant dense<0.000000e+00> : vector<32x32xf32>
    %35 = tpu.matmul %0, %34, %cst_44 {dimension_numbers = #tpu.dot_dimension_numbers<[1], [0], [0], [1], [0, 0, 1, 1], [], []>} : vector<32x32xf32>, vector<32x32xf32>, vector<32x32xf32> -> vector<32x32xf32>
    %cst_45 = arith.constant dense<0.000000e+00> : vector<32x32xf32>
    %36 = tpu.matmul %35, %2, %cst_45 {dimension_numbers = #tpu.dot_dimension_numbers<[1], [0], [0], [1], [0, 0, 1, 1], [], []>} : vector<32x32xf32>, vector<32x32xf32>, vector<32x32xf32> -> vector<32x32xf32>
    %c0_46 = arith.constant 0 : index
    %c96 = arith.constant 96 : index
    %37 = vector.load %arg6[%c0_46, %c96] : memref<32x128xf32, #tpu.memory_space<vmem>>, vector<32x32xf32>
    tpu.vector_store %arg6[%c0_46, %c96], %36 {strides = array<i32>} : memref<32x128xf32, #tpu.memory_space<vmem>>, vector<32x32xf32>,
    %c3_47 = arith.constant 3 : index
    %c0_48 = arith.constant 0 : index
    %c0_49 = arith.constant 0 : index
    %38 = vector.load %arg2[%c3_47, %c0_48, %c0_49] : memref<4x32x32xf32, #tpu.memory_space<vmem>>, vector<1x32x32xf32>
    %39 = vector.shape_cast %38 : vector<1x32x32xf32> to vector<32x32xf32>
    %cst_50 = arith.constant dense<0.000000e+00> : vector<32x32xf32>
    %40 = tpu.matmul %1, %39, %cst_50 {dimension_numbers = #tpu.dot_dimension_numbers<[1], [0], [0], [1], [0, 0, 1, 1], [], []>} : vector<32x32xf32>, vector<32x32xf32>, vector<32x32xf32> -> vector<32x32xf32>
    %cst_51 = arith.constant dense<0.000000e+00> : vector<32x32xf32>
    %41 = tpu.matmul %40, %2, %cst_51 {dimension_numbers = #tpu.dot_dimension_numbers<[1], [0], [0], [1], [0, 0, 1, 1], [], []>} : vector<32x32xf32>, vector<32x32xf32>, vector<32x32xf32> -> vector<32x32xf32>
    %c0_52 = arith.constant 0 : index
    %c96_53 = arith.constant 96 : index
    %42 = vector.load %arg7[%c0_52, %c96_53] : memref<32x128xf32, #tpu.memory_space<vmem>>, vector<32x32xf32>
    tpu.vector_store %arg7[%c0_52, %c96_53], %41 {strides = array<i32>} : memref<32x128xf32, #tpu.memory_space<vmem>>, vector<32x32xf32>,
    return
  }
  func.func @transform_0(%arg0: i32) -> (i32, i32, i32) {
    %c0_i32 = arith.constant 0 : i32
    %c0_i32_0 = arith.constant 0 : i32
    %c0_i32_1 = arith.constant 0 : i32
    %c0_i32_2 = arith.constant 0 : i32
    return %c0_i32, %c0_i32_0, %c0_i32_1 : i32, i32, i32
  }
  func.func @transform_1(%arg0: i32) -> (i32, i32, i32) {
    %c0_i32 = arith.constant 0 : i32
    %c0_i32_0 = arith.constant 0 : i32
    %c0_i32_1 = arith.constant 0 : i32
    %c0_i32_2 = arith.constant 0 : i32
    return %c0_i32, %c0_i32_0, %c0_i32_1 : i32, i32, i32
  }
  func.func @transform_2(%arg0: i32) -> (i32, i32) {
    %c0_i32 = arith.constant 0 : i32
    %c0_i32_0 = arith.constant 0 : i32
    %c0_i32_1 = arith.constant 0 : i32
    return %c0_i32, %c0_i32_0 : i32, i32
  }
  func.func @transform_3(%arg0: i32) -> (i32, i32) {
    %c0_i32 = arith.constant 0 : i32
    %c0_i32_0 = arith.constant 0 : i32
    %c0_i32_1 = arith.constant 0 : i32
    return %c0_i32, %c0_i32_0 : i32, i32
  }
  func.func @transform_4(%arg0: i32) -> (i32, i32) {
    %c0_i32 = arith.constant 0 : i32
    %c0_i32_0 = arith.constant 0 : i32
    %c0_i32_1 = arith.constant 0 : i32
    return %c0_i32, %c0_i32_0 : i32, i32
  }
  func.func @transform_5(%arg0: i32) -> (i32, i32) {
    %c0_i32 = arith.constant 0 : i32
    %c0_i32_0 = arith.constant 0 : i32
    %c0_i32_1 = arith.constant 0 : i32
    return %c0_i32, %c0_i32_0 : i32, i32
  }
  func.func @transform_6(%arg0: i32) -> (i32, i32) {
    %c0_i32 = arith.constant 0 : i32
    %c0_i32_0 = arith.constant 0 : i32
    %c0_i32_1 = arith.constant 0 : i32
    return %c0_i32, %c0_i32_0 : i32, i32
  }
}

</mosaic_0001>

<bundles_post_ra>
// kernel: tpu_custom_call.1
= control target key start
LH: loop header
LB: loop body
LE: loop exit
PB: predicated region body
PF: predicated region fallthrough
CT: control target
= control target key end

     0   :  { %12 = vsyncpa [#allocation3], 0  ;;  %s2855_s0 = inlined_call_operand.hbm [shape: f32[4,32,32], index: 0, kind: input, shape index: {}]   ;;  %s2856_s1 = inlined_call_operand.hbm [shape: f32[4,32,32], index: 1, kind: input, shape index: {}]   ;;  %s2857_s2 = inlined_call_operand.hbm [shape: f32[32,32], index: 2, kind: input, shape index: {}]   ;;  %s2858_s3 = inlined_call_operand.hbm [shape: f32[32,32], index: 3, kind: input, shape index: {}]   ;;  %s2859_s4 = inlined_call_operand.hbm [shape: f32[32,32], index: 4, kind: input, shape index: {}]   ;;  %s2860_s5 = inlined_call_operand.hbm [shape: f32[32,128], index: 5, kind: output, shape index: {0}]   ;;  %s2861_s6 = inlined_call_operand.hbm [shape: f32[32,128], index: 6, kind: output, shape index: {1}]  }
   0x1   :  { %13 = vsyncpa [#allocation6], 0 }
   0x2   :  { %14 = vsyncpa [#allocation9], 0 }
   0x3   :  { %15 = vsyncpa [#allocation4], 0 }
   0x4   :  { %16 = vsyncpa [#allocation13], 0  ;;  %s2509_s21 = smov [#allocation5]   ;;  %s2510_s23 = smov [#allocation8]  }
   0x5   :  { %s34_s22 = sshll.u32 %s2509_s21, 4  ;;  %s58_s24 = sshll.u32 %s2510_s23, 4  ;;  %s35_s22 = int_to_ptr.vmem [resolvable:$true] %s34_s22  ;;  %s2556_s24 = int_to_ptr.vmem [resolvable:$true] %s58_s24 }
   0x6   :  { %s2345_s27 = scalar_lea.hbm %s2856_s1, 2048 }
   0x7   :  { %p2346_p0 = scmp.ne.s32.totalorder %s2856_s1, %s2345_s27  ;;  %p2349_p1 = scmp.lt.u32.totalorder %s2345_s27, %s2856_s1 }
   0x9   :  { %p2351_p2 = pnand %p2349_p1, %p2346_p0 }
   0xb   :  { %2354 = shalt.err (!%p2351_p2)
}
   0xc   :  { %s2355_s8 = scalar_lea.vmem %s35_s22, 2048  ;;  %p2360_p4 = scmp.lt.s32.totalorder %s35_s22, %s35_s22 }
   0xd   :  { %p2356_p3 = scmp.ne.s32.totalorder %s35_s22, %s2355_s8  ;;  %p2361_p5 = scmp.lt.s32.totalorder %s2355_s8, %s2355_s8 }
   0xf   :  { %p2362_p6 = por %p2361_p5, %p2360_p4 }
  0x11   :  { %p2363_p7 = pnand %p2362_p6, %p2356_p3 }
  0x13   :  { %2366 = shalt.err (!%p2363_p7)
}
  0x14   :  { %s2511_s9 = smov 128   ;;  %s2512_s10 = smov 8  }
  0x15   :  { %40 = dma.hbm_to_vmem [thread:$0]  %s2856_s1, 2048, %s35_s22, [#allocation6], %s2511_s9, %s2511_s9, %s2512_s10  }
  0x16   :  { %s2367_s15 = scalar_lea.hbm %s2858_s3, 512 }
  0x17   :  { %p2368_p8 = scmp.ne.s32.totalorder %s2858_s3, %s2367_s15  ;;  %p2371_p9 = scmp.lt.u32.totalorder %s2367_s15, %s2858_s3 }
  0x19   :  { %p2373_p10 = pnand %p2371_p9, %p2368_p8 }
  0x1b   :  { %2376 = shalt.err (!%p2373_p10)
}
  0x1c   :  { %s2377_s20 = scalar_lea.vmem %s2556_s24, 512  ;;  %p2382_p12 = scmp.lt.s32.totalorder %s2556_s24, %s2556_s24 }
  0x1d   :  { %p2378_p11 = scmp.ne.s32.totalorder %s2556_s24, %s2377_s20  ;;  %p2383_p13 = scmp.lt.s32.totalorder %s2377_s20, %s2377_s20 }
  0x1f   :  { %p2384_p0 = por %p2383_p13, %p2382_p12 }
  0x21   :  { %p2385_p1 = pnand %p2384_p0, %p2378_p11 }
  0x23   :  { %2388 = shalt.err (!%p2385_p1)
}
  0x24   :  { %64 = dma.hbm_to_vmem [thread:$0]  %s2858_s3, 512, %s2556_s24, [#allocation9], %s2511_s9, %s2511_s9, %s2512_s10  }
  0x25   :  { %s2513_s22 = smov [#allocation2]   ;;  %s2514_s25 = smov [#allocation7]  }
  0x26   :  { %s22_s23 = sshll.u32 %s2513_s22, 4  ;;  %s46_s26 = sshll.u32 %s2514_s25, 4  ;;  %s23_s23 = int_to_ptr.vmem [resolvable:$true] %s22_s23  ;;  %s2593_s26 = int_to_ptr.vmem [resolvable:$true] %s46_s26 }
  0x27   :  { %s2389_s29 = scalar_lea.hbm %s2855_s0, 2048 }
  0x28   :  { %p2390_p2 = scmp.ne.s32.totalorder %s2855_s0, %s2389_s29  ;;  %p2393_p3 = scmp.lt.u32.totalorder %s2389_s29, %s2855_s0 }
  0x2a   :  { %p2395_p4 = pnand %p2393_p3, %p2390_p2 }
  0x2c   :  { %2398 = shalt.err (!%p2395_p4)
}
  0x2d   :  { %s2399_s3 = scalar_lea.vmem %s23_s23, 2048  ;;  %p2404_p6 = scmp.lt.s32.totalorder %s23_s23, %s23_s23 }
  0x2e   :  { %p2400_p5 = scmp.ne.s32.totalorder %s23_s23, %s2399_s3  ;;  %p2405_p7 = scmp.lt.s32.totalorder %s2399_s3, %s2399_s3 }
  0x30   :  { %p2406_p8 = por %p2405_p7, %p2404_p6 }
  0x32   :  { %p2407_p9 = pnand %p2406_p8, %p2400_p5 }
  0x34   :  { %2410 = shalt.err (!%p2407_p9)
}
  0x35   :  { %28 = dma.hbm_to_vmem [thread:$0]  %s2855_s0, 2048, %s23_s23, [#allocation3], %s2511_s9, %s2511_s9, %s2512_s10  }
  0x36   :  { %s2411_s15 = scalar_lea.hbm %s2857_s2, 512 }
  0x37   :  { %p2412_p10 = scmp.ne.s32.totalorder %s2857_s2, %s2411_s15  ;;  %p2415_p11 = scmp.lt.u32.totalorder %s2411_s15, %s2857_s2 }
  0x39   :  { %p2417_p12 = pnand %p2415_p11, %p2412_p10 }
  0x3b   :  { %2420 = shalt.err (!%p2417_p12)
}
  0x3c   :  { %s2421_s20 = scalar_lea.vmem %s2593_s26, 512  ;;  %p2426_p0 = scmp.lt.s32.totalorder %s2593_s26, %s2593_s26 }
  0x3d   :  { %p2422_p13 = scmp.ne.s32.totalorder %s2593_s26, %s2421_s20  ;;  %p2427_p1 = scmp.lt.s32.totalorder %s2421_s20, %s2421_s20 }
  0x3f   :  { %p2428_p2 = por %p2427_p1, %p2426_p0 }
  0x41   :  { %p2429_p3 = pnand %p2428_p2, %p2422_p13 }
  0x43   :  { %2432 = shalt.err (!%p2429_p3)
}
  0x44   :  { %52 = dma.hbm_to_vmem [thread:$0]  %s2857_s2, 512, %s2593_s26, [#allocation6], %s2511_s9, %s2511_s9, %s2512_s10  }
  0x45   :  { %s2515_s21 = smov [#allocation10]   ;;  %s2433_s27 = scalar_lea.hbm %s2859_s4, 512 }
  0x46   :  { %s70_s22 = sshll.u32 %s2515_s21, 4  ;;  %p2434_p4 = scmp.ne.s32.totalorder %s2859_s4, %s2433_s27  ;;  %s71_s22 = int_to_ptr.vmem [resolvable:$true] %s70_s22 }
  0x47   :  { %p2437_p5 = scmp.lt.u32.totalorder %s2433_s27, %s2859_s4 }
  0x49   :  { %p2439_p6 = pnand %p2437_p5, %p2434_p4 }
  0x4b   :  { %2442 = shalt.err (!%p2439_p6)
}
  0x4c   :  { %s2443_s8 = scalar_lea.vmem %s71_s22, 512  ;;  %p2448_p8 = scmp.lt.s32.totalorder %s71_s22, %s71_s22 }
  0x4d   :  { %p2444_p7 = scmp.ne.s32.totalorder %s71_s22, %s2443_s8  ;;  %p2449_p9 = scmp.lt.s32.totalorder %s2443_s8, %s2443_s8 }
  0x4f   :  { %p2450_p10 = por %p2449_p9, %p2448_p8 }
  0x51   :  { %p2451_p11 = pnand %p2450_p10, %p2444_p7 }
  0x53   :  { %2454 = shalt.err (!%p2451_p11)
}
  0x54   :  { %76 = dma.hbm_to_vmem [thread:$0]  %s2859_s4, 512, %s71_s22, [#allocation9], %s2511_s9, %s2511_s9, %s2512_s10  }
  0x55   :  { %2499 = dma.done.wait [#allocation3], 2048  }
  0x56   :  { %2500 = vsyncadd [#allocation3], 4294965248 }
  0x57   :  { %2501 = dma.done.wait [#allocation6], 2560  }
  0x58   :  { %2502 = vsyncadd [#allocation6], 4294964736 }
  0x59   :  { %2503 = dma.done.wait [#allocation9], 1024  }
  0x5a   :  { %2504 = vsyncadd [#allocation9], 4294966272  ;;  %vm108_vm0 = vcmask 261120   ;;  %v104_v0 = vld [vmem:[#allocation2] sm:$0xff]  ;;  %v105_v1 = vld [vmem:[#allocation2 + $0x8] sm:$0xff]  ;;  %s2516_s4 = smov 32  }
  0x5b   :  { %v106_v2 = vld [vmem:[#allocation2 + $0x10] sm:$0xff]  ;;  %v2205_v3 = vpack.c.bf16 %v105_v1, %v104_v0  ;;  %v107_v4 = vld [vmem:[#allocation2 + $0x18] sm:$0xff]  ;;  %v2645_v5 = vld [vmem:[#allocation7] sm:$0xff]  ;;  %s2517_s11 = smov 64   ;;  %s2518_s3 = smov 96   ;;  %vm712_vm1 = vcmask 523520  }
  0x5c   :  { %v2209_v6 = vpack.c.bf16 %v107_v4, %v106_v2  ;;  %1989 = vmatprep.mubr.msk.f32.mxu0 %vm108_vm0, %v2645_v5  ;;  %v307_v7 = vld [vmem:[#allocation5] sm:$0xff]  ;;  %v308_v8 = vld [vmem:[#allocation5 + $0x8] sm:$0xff]  ;;  %v309_v10 = vld [vmem:[#allocation5 + $0x10] sm:$0xff]  ;;  %vm1127_vm2 = vcmask 785920   ;;  %vm1542_vm3 = vcmask 1048320   ;;  %s2519_s24 = smov [#allocation11]  }
  0x5d   :  { %2206 = vmatprep.subr.bf16.mxu0 %v2205_v3  ;;  %v2221_v9 = vpack.c.bf16 %v308_v8, %v307_v7  ;;  %v310_v11 = vld [vmem:[#allocation5 + $0x18] sm:$0xff]  ;;  %v2649_v12 = vld [vmem:[#allocation7 + $0x8] sm:$0xff]  ;;  %v2651_v13 = vld [vmem:[#allocation7 + $0x10] sm:$0xff]  ;;  %s1759_s12 = sshll.u32 %s2519_s24, 4  ;;  %s1760_s12 = int_to_ptr.vmem [resolvable:$true] %s1759_s12 }
  0x5e   :  { %2208 = vmatpush3.bf16.msra.mxu0 %v2205_v3  ;;  %v2225_v14 = vpack.c.bf16 %v310_v11, %v309_v10  ;;  %v510_v15 = vld [vmem:[#allocation2 + $0x20] sm:$0xff]  ;;  %v511_v16 = vld [vmem:[#allocation2 + $0x28] sm:$0xff]  ;;  %v2657_v17 = vld [vmem:[#allocation7 + $0x18] sm:$0xff]  ;;  %s2455_s13 = scalar_lea.vmem %s1760_s12, 512  ;;  %p2460_p13 = scmp.lt.s32.totalorder %s1760_s12, %s1760_s12 }
  0x5f   :  { %2210 = vmatprep.subr.bf16.mxu0 %v2209_v6  ;;  %v2659_v18 = vld [vmem:[#allocation8] sm:$0xff]  ;;  %v2237_v19 = vpack.c.bf16 %v511_v16, %v510_v15  ;;  %v512_v20 = vld [vmem:[#allocation2 + $0x30] sm:$0xff]  ;;  %v101_v22 = vld [vmem:[#allocation10 + $0x8] sm:$0xff]  ;;  %p2456_p12 = scmp.ne.s32.totalorder %s1760_s12, %s2455_s13  ;;  %p2461_p0 = scmp.lt.s32.totalorder %s2455_s13, %s2455_s13 }
  0x60   :  { %v100_v21 = vld [vmem:[#allocation10] sm:$0xff]  ;;  %v513_v23 = vld [vmem:[#allocation2 + $0x38] sm:$0xff]  ;;  %v102_v25 = vld [vmem:[#allocation10 + $0x10] sm:$0xff] }
  0x61   :  { %v2661_v24 = vpack.c.bf16 %v101_v22, %v100_v21  ;;  %v103_v26 = vld [vmem:[#allocation10 + $0x18] sm:$0xff]  ;;  %v2669_v28 = vld [vmem:[#allocation8 + $0x8] sm:$0xff]  ;;  %v2671_v29 = vld [vmem:[#allocation8 + $0x10] sm:$0xff]  ;;  %v2241_v30 = vpack.c.bf16 %v513_v23, %v512_v20  ;;  %p2462_p1 = por %p2461_p0, %p2460_p13 }
  0x62   :  { %2212 = vmatpush3.bf16.msra.mxu0 %v2209_v6  ;;  %v2665_v27 = vpack.c.bf16 %v103_v26, %v102_v25  ;;  %v718_v31 = vld [vmem:[#allocation5 + $0x20] sm:$0xff]  ;;  %v719_v32 = vld [vmem:[#allocation5 + $0x28] sm:$0xff]  ;;  %v2680_v33 = vld [vmem:[#allocation8 + $0x18] sm:$0xff] }
  0x63   :  { %2222 = vmatprep.subr.bf16.mxu0 %v2221_v9  ;;  %2214 = vmatprep.subr.bf16.mxu1 %v2661_v24  ;;  %v2253_v34 = vpack.c.bf16 %v719_v32, %v718_v31  ;;  %v720_v35 = vld [vmem:[#allocation5 + $0x30] sm:$0xff]  ;;  %v721_v36 = vld [vmem:[#allocation5 + $0x38] sm:$0xff]  ;;  %v925_v38 = vld [vmem:[#allocation2 + $0x40] sm:$0xff]  ;;  %p2463_p2 = pnand %p2462_p1, %p2456_p12 }
  0x64   :  { %2216 = vmatpush3.bf16.msra.mxu1 %v2661_v24  ;;  %v2257_v37 = vpack.c.bf16 %v721_v36, %v720_v35  ;;  %v926_v39 = vld [vmem:[#allocation2 + $0x48] sm:$0xff]  ;;  %v927_v41 = vld [vmem:[#allocation2 + $0x50] sm:$0xff]  ;;  %v928_v42 = vld [vmem:[#allocation2 + $0x58] sm:$0xff] }
  0x65   :  { %1990 = vmatmul.mubr.msk.f32.vlgmr.msra.gmra.mrb[0].mxu0 %vm108_vm0, %v2649_v12  ;;  %2218 = vmatprep.subr.bf16.mxu1 %v2665_v27  ;;  %v2269_v40 = vpack.c.bf16 %v926_v39, %v925_v38  ;;  %v2273_v43 = vpack.c.bf16 %v928_v42, %v927_v41  ;;  %v1133_v44 = vld [vmem:[#allocation5 + $0x40] sm:$0xff]  ;;  %v1134_v45 = vld [vmem:[#allocation5 + $0x48] sm:$0xff]  ;;  %v1135_v47 = vld [vmem:[#allocation5 + $0x50] sm:$0xff] }
  0x66   :  { %2224 = vmatpush3.bf16.msra.mxu0 %v2221_v9  ;;  %1992 = vmatprep.mubr.msk.f32.mxu0 %vm108_vm0, %v2651_v13  ;;  %v2285_v46 = vpack.c.bf16 %v1134_v45, %v1133_v44  ;;  %v1136_v48 = vld [vmem:[#allocation5 + $0x58] sm:$0xff]  ;;  %v1340_v50 = vld [vmem:[#allocation2 + $0x60] sm:$0xff]  ;;  %v1341_v51 = vld [vmem:[#allocation2 + $0x68] sm:$0xff] }
  0x67   :  { %2226 = vmatprep.subr.bf16.mxu0 %v2225_v14  ;;  %v2289_v49 = vpack.c.bf16 %v1136_v48, %v1135_v47  ;;  %v2301_v52 = vpack.c.bf16 %v1341_v51, %v1340_v50  ;;  %v1342_v53 = vld [vmem:[#allocation2 + $0x70] sm:$0xff]  ;;  %v1343_v54 = vld [vmem:[#allocation2 + $0x78] sm:$0xff]  ;;  %v1548_v56 = vld [vmem:[#allocation5 + $0x60] sm:$0xff] }
  0x68   :  { %2220 = vmatpush3.bf16.msra.mxu1 %v2665_v27  ;;  %v2305_v55 = vpack.c.bf16 %v1343_v54, %v1342_v53  ;;  %v1549_v57 = vld [vmem:[#allocation5 + $0x68] sm:$0xff]  ;;  %v1550_v59 = vld [vmem:[#allocation5 + $0x70] sm:$0xff]  ;;  %v1551_v60 = vld [vmem:[#allocation5 + $0x78] sm:$0xff] }
  0x69   :  { %1993 = vmatmul.mubr.msk.f32.gmra.mrb[2].mxu0 %vm108_vm0, %v2657_v17  ;;  %2230 = vmatprep.subr.bf16.mxu1 %v2661_v24  ;;  %v2317_v58 = vpack.c.bf16 %v1549_v57, %v1548_v56  ;;  %v2321_v61 = vpack.c.bf16 %v1551_v60, %v1550_v59 }
  0x6a   :  { %2228 = vmatpush3.bf16.msra.mxu0 %v2225_v14  ;;  %2017 = vmatprep.mubr.msk.f32.mxu0 %vm108_vm0, %v2659_v18 }
  0x6b   :  { %2238 = vmatprep.subr.bf16.mxu0 %v2237_v19 }
  0x6d   :  { %2018 = vmatmul.mubr.msk.f32.vlgmr.msra.gmra.mrb[4].mxu0 %vm108_vm0, %v2669_v28 }
  0x6e   :  { %2240 = vmatpush3.bf16.msra.mxu0 %v2237_v19  ;;  %2020 = vmatprep.mubr.msk.f32.mxu0 %vm108_vm0, %v2671_v29 }
  0x6f   :  { %2242 = vmatprep.subr.bf16.mxu0 %v2241_v30 }
  0x71   :  { %2021 = vmatmul.mubr.msk.f32.gmra.mrb[6].mxu0 %vm108_vm0, %v2680_v33 }
  0x72   :  { %2244 = vmatpush3.bf16.msra.mxu0 %v2241_v30  ;;  %2045 = vmatprep.mubr.msk.f32.mxu0 %vm108_vm0, %v2645_v5 }
  0x73   :  { %2254 = vmatprep.subr.bf16.mxu0 %v2253_v34 }
  0x75   :  { %2046 = vmatmul.mubr.msk.f32.vlgmr.msra.gmra.mrb[8].mxu0 %vm108_vm0, %v2649_v12 }
  0x76   :  { %2256 = vmatpush3.bf16.msra.mxu0 %v2253_v34  ;;  %2048 = vmatprep.mubr.msk.f32.mxu0 %vm108_vm0, %v2651_v13 }
  0x77   :  { %2258 = vmatprep.subr.bf16.mxu0 %v2257_v37 }
  0x79   :  { %2049 = vmatmul.mubr.msk.f32.gmra.mrb[10].mxu0 %vm108_vm0, %v2657_v17 }
  0x7a   :  { %2260 = vmatpush3.bf16.msra.mxu0 %v2257_v37  ;;  %2073 = vmatprep.mubr.msk.f32.mxu0 %vm108_vm0, %v2659_v18 }
  0x7b   :  { %2270 = vmatprep.subr.bf16.mxu0 %v2269_v40 }
  0x7d   :  { %2074 = vmatmul.mubr.msk.f32.vlgmr.msra.gmra.mrb[12].mxu0 %vm108_vm0, %v2669_v28 }
  0x7e   :  { %2272 = vmatpush3.bf16.msra.mxu0 %v2269_v40  ;;  %2076 = vmatprep.mubr.msk.f32.mxu0 %vm108_vm0, %v2671_v29 }
  0x7f   :  { %2274 = vmatprep.subr.bf16.mxu0 %v2273_v43 }
  0x81   :  { %2077 = vmatmul.mubr.msk.f32.gmra.mrb[14].mxu0 %vm108_vm0, %v2680_v33 }
  0x82   :  { %2276 = vmatpush3.bf16.msra.mxu0 %v2273_v43  ;;  %2101 = vmatprep.mubr.msk.f32.mxu0 %vm108_vm0, %v2645_v5 }
  0x83   :  { %2286 = vmatprep.subr.bf16.mxu0 %v2285_v46 }
  0x85   :  { %2102 = vmatmul.mubr.msk.f32.vlgmr.msra.gmra.mrb[16].mxu0 %vm108_vm0, %v2649_v12 }
  0x86   :  { %2288 = vmatpush3.bf16.msra.mxu0 %v2285_v46  ;;  %2104 = vmatprep.mubr.msk.f32.mxu0 %vm108_vm0, %v2651_v13 }
  0x87   :  { %2290 = vmatprep.subr.bf16.mxu0 %v2289_v49 }
  0x89   :  { %2105 = vmatmul.mubr.msk.f32.gmra.mrb[18].mxu0 %vm108_vm0, %v2657_v17 }
  0x8a   :  { %2292 = vmatpush3.bf16.msra.mxu0 %v2289_v49  ;;  %2129 = vmatprep.mubr.msk.f32.mxu0 %vm108_vm0, %v2659_v18 }
  0x8b   :  { %2302 = vmatprep.subr.bf16.mxu0 %v2301_v52 }
  0x8d   :  { %2130 = vmatmul.mubr.msk.f32.vlgmr.msra.gmra.mrb[20].mxu0 %vm108_vm0, %v2669_v28 }
  0x8e   :  { %2304 = vmatpush3.bf16.msra.mxu0 %v2301_v52  ;;  %2132 = vmatprep.mubr.msk.f32.mxu0 %vm108_vm0, %v2671_v29 }
  0x8f   :  { %2306 = vmatprep.subr.bf16.mxu0 %v2305_v55 }
  0x91   :  { %2133 = vmatmul.mubr.msk.f32.gmra.mrb[22].mxu0 %vm108_vm0, %v2680_v33 }
  0x92   :  { %2308 = vmatpush3.bf16.msra.mxu0 %v2305_v55  ;;  %2157 = vmatprep.mubr.msk.f32.mxu0 %vm108_vm0, %v2645_v5 }
  0x93   :  { %2318 = vmatprep.subr.bf16.mxu0 %v2317_v58 }
  0x95   :  { %2158 = vmatmul.mubr.msk.f32.vlgmr.msra.gmra.mrb[24].mxu0 %vm108_vm0, %v2649_v12 }
  0x96   :  { %2320 = vmatpush3.bf16.msra.mxu0 %v2317_v58  ;;  %2160 = vmatprep.mubr.msk.f32.mxu0 %vm108_vm0, %v2651_v13 }
  0x97   :  { %2322 = vmatprep.subr.bf16.mxu0 %v2321_v61 }
  0x99   :  { %2161 = vmatmul.mubr.msk.f32.gmra.mrb[26].mxu0 %vm108_vm0, %v2657_v17 }
  0x9a   :  { %2324 = vmatpush3.bf16.msra.mxu0 %v2321_v61  ;;  %2185 = vmatprep.mubr.msk.f32.mxu0 %vm108_vm0, %v2659_v18 }
  0x9d   :  { %2186 = vmatmul.mubr.msk.f32.vlgmr.msra.gmra.mrb[28].mxu0 %vm108_vm0, %v2669_v28 }
  0x9e   :  { %2188 = vmatprep.mubr.msk.f32.mxu0 %vm108_vm0, %v2671_v29 }
  0xa1   :  { %2189 = vmatmul.mubr.msk.f32.gmra.mrb[30].mxu0 %vm108_vm0, %v2680_v33 }
 0x138   :  { %v1991_v62 = vpop.f32.mrb[0].mxu0 }
 0x139   :  { %v187_v63 = vpop.f32.mrb[1].mxu0 }
 0x13a   :  { %2003 = vmatprep.mubr.msk.f32.mxu1 %vm108_vm0, %v187_v63 }
 0x13b   :  { %2004 = vmatmul.mubr.msk.f32.vlgmr.msra.gmra.mrb[0].mxu1 %vm108_vm0, %v1991_v62 }
 0x13c   :  { %v1994_v0 = vpop.f32.mrb[2].mxu0  ;;  %2232 = vmatpush3.bf16.msra.mxu1 %v2661_v24 }
 0x13d   :  { %v197_v1 = vpop.f32.mrb[3].mxu0  ;;  %2234 = vmatprep.subr.bf16.mxu1 %v2665_v27 }
 0x13e   :  { %2006 = vmatprep.mubr.msk.f32.mxu1 %vm108_vm0, %v197_v1 }
 0x13f   :  { %2007 = vmatmul.mubr.msk.f32.gmra.mrb[2].mxu1 %vm108_vm0, %v1994_v0 }
 0x140   :  { %v2019_v2 = vpop.f32.mrb[4].mxu0  ;;  %2236 = vmatpush3.bf16.msra.mxu1 %v2665_v27 }
 0x141   :  { %v389_v3 = vpop.f32.mrb[5].mxu0  ;;  %2246 = vmatprep.subr.bf16.mxu1 %v2661_v24 }
 0x142   :  { %2031 = vmatprep.mubr.msk.f32.mxu1 %vm108_vm0, %v389_v3 }
 0x143   :  { %2032 = vmatmul.mubr.msk.f32.vlgmr.msra.gmra.mrb[4].mxu1 %vm108_vm0, %v2019_v2 }
 0x144   :  { %v2022_v4 = vpop.f32.mrb[6].mxu0  ;;  %2248 = vmatpush3.bf16.msra.mxu1 %v2661_v24 }
 0x145   :  { %v399_v5 = vpop.f32.mrb[7].mxu0  ;;  %2250 = vmatprep.subr.bf16.mxu1 %v2665_v27 }
 0x146   :  { %2034 = vmatprep.mubr.msk.f32.mxu1 %vm108_vm0, %v399_v5 }
 0x147   :  { %2035 = vmatmul.mubr.msk.f32.gmra.mrb[6].mxu1 %vm108_vm0, %v2022_v4 }
 0x148   :  { %v2047_v6 = vpop.f32.mrb[8].mxu0  ;;  %2252 = vmatpush3.bf16.msra.mxu1 %v2665_v27 }
 0x149   :  { %v580_v7 = vpop.f32.mrb[9].mxu0  ;;  %2262 = vmatprep.subr.bf16.mxu1 %v2661_v24 }
 0x14a   :  { %2059 = vmatprep.mubr.msk.f32.mxu1 %vm108_vm0, %v580_v7 }
 0x14b   :  { %2060 = vmatmul.mubr.msk.f32.vlgmr.msra.gmra.mrb[8].mxu1 %vm108_vm0, %v2047_v6 }
 0x14c   :  { %v2050_v8 = vpop.f32.mrb[10].mxu0  ;;  %2264 = vmatpush3.bf16.msra.mxu1 %v2661_v24 }
 0x14d   :  { %v590_v9 = vpop.f32.mrb[11].mxu0  ;;  %2266 = vmatprep.subr.bf16.mxu1 %v2665_v27 }
 0x14e   :  { %2062 = vmatprep.mubr.msk.f32.mxu1 %vm108_vm0, %v590_v9 }
 0x14f   :  { %2063 = vmatmul.mubr.msk.f32.gmra.mrb[10].mxu1 %vm108_vm0, %v2050_v8 }
 0x150   :  { %v2075_v10 = vpop.f32.mrb[12].mxu0  ;;  %2268 = vmatpush3.bf16.msra.mxu1 %v2665_v27 }
 0x151   :  { %v788_v11 = vpop.f32.mrb[13].mxu0  ;;  %2278 = vmatprep.subr.bf16.mxu1 %v2661_v24 }
 0x152   :  { %2087 = vmatprep.mubr.msk.f32.mxu1 %vm108_vm0, %v788_v11 }
 0x153   :  { %2088 = vmatmul.mubr.msk.f32.vlgmr.msra.gmra.mrb[12].mxu1 %vm108_vm0, %v2075_v10 }
 0x154   :  { %v2078_v12 = vpop.f32.mrb[14].mxu0  ;;  %2280 = vmatpush3.bf16.msra.mxu1 %v2661_v24 }
 0x155   :  { %v798_v13 = vpop.f32.mrb[15].mxu0  ;;  %2282 = vmatprep.subr.bf16.mxu1 %v2665_v27 }
 0x156   :  { %2090 = vmatprep.mubr.msk.f32.mxu1 %vm108_vm0, %v798_v13 }
 0x157   :  { %2091 = vmatmul.mubr.msk.f32.gmra.mrb[14].mxu1 %vm108_vm0, %v2078_v12 }
 0x158   :  { %v2103_v14 = vpop.f32.mrb[16].mxu0  ;;  %2284 = vmatpush3.bf16.msra.mxu1 %v2665_v27 }
 0x159   :  { %v995_v15 = vpop.f32.mrb[17].mxu0  ;;  %2294 = vmatprep.subr.bf16.mxu1 %v2661_v24 }
 0x15a   :  { %2115 = vmatprep.mubr.msk.f32.mxu1 %vm108_vm0, %v995_v15 }
 0x15b   :  { %2116 = vmatmul.mubr.msk.f32.vlgmr.msra.gmra.mrb[16].mxu1 %vm108_vm0, %v2103_v14 }
 0x15c   :  { %v2106_v16 = vpop.f32.mrb[18].mxu0  ;;  %2296 = vmatpush3.bf16.msra.mxu1 %v2661_v24 }
 0x15d   :  { %v1005_v17 = vpop.f32.mrb[19].mxu0  ;;  %2298 = vmatprep.subr.bf16.mxu1 %v2665_v27 }
 0x15e   :  { %2118 = vmatprep.mubr.msk.f32.mxu1 %vm108_vm0, %v1005_v17 }
 0x15f   :  { %2119 = vmatmul.mubr.msk.f32.gmra.mrb[18].mxu1 %vm108_vm0, %v2106_v16 }
 0x160   :  { %v2131_v18 = vpop.f32.mrb[20].mxu0  ;;  %2300 = vmatpush3.bf16.msra.mxu1 %v2665_v27 }
 0x161   :  { %v1203_v19 = vpop.f32.mrb[21].mxu0  ;;  %2310 = vmatprep.subr.bf16.mxu1 %v2661_v24 }
 0x162   :  { %2143 = vmatprep.mubr.msk.f32.mxu1 %vm108_vm0, %v1203_v19 }
 0x163   :  { %2144 = vmatmul.mubr.msk.f32.vlgmr.msra.gmra.mrb[20].mxu1 %vm108_vm0, %v2131_v18 }
 0x164   :  { %v2134_v20 = vpop.f32.mrb[22].mxu0  ;;  %2312 = vmatpush3.bf16.msra.mxu1 %v2661_v24 }
 0x165   :  { %v1213_v21 = vpop.f32.mrb[23].mxu0  ;;  %2314 = vmatprep.subr.bf16.mxu1 %v2665_v27 }
 0x166   :  { %2146 = vmatprep.mubr.msk.f32.mxu1 %vm108_vm0, %v1213_v21 }
 0x167   :  { %2147 = vmatmul.mubr.msk.f32.gmra.mrb[22].mxu1 %vm108_vm0, %v2134_v20 }
 0x168   :  { %v2159_v22 = vpop.f32.mrb[24].mxu0  ;;  %2316 = vmatpush3.bf16.msra.mxu1 %v2665_v27 }
 0x169   :  { %v1410_v23 = vpop.f32.mrb[25].mxu0  ;;  %2326 = vmatprep.subr.bf16.mxu1 %v2661_v24 }
 0x16a   :  { %2171 = vmatprep.mubr.msk.f32.mxu1 %vm108_vm0, %v1410_v23 }
 0x16b   :  { %2172 = vmatmul.mubr.msk.f32.vlgmr.msra.gmra.mrb[24].mxu1 %vm108_vm0, %v2159_v22 }
 0x16c   :  { %v2162_v25 = vpop.f32.mrb[26].mxu0  ;;  %2328 = vmatpush3.bf16.msra.mxu1 %v2661_v24 }
 0x16d   :  { %v1420_v26 = vpop.f32.mrb[27].mxu0  ;;  %2330 = vmatprep.subr.bf16.mxu1 %v2665_v27 }
 0x16e   :  { %2174 = vmatprep.mubr.msk.f32.mxu1 %vm108_vm0, %v1420_v26 }
 0x16f   :  { %2175 = vmatmul.mubr.msk.f32.gmra.mrb[26].mxu1 %vm108_vm0, %v2162_v25 }
 0x170   :  { %v2187_v28 = vpop.f32.mrb[28].mxu0  ;;  %2332 = vmatpush3.bf16.msra.mxu1 %v2665_v27 }
 0x171   :  { %v1618_v29 = vpop.f32.mrb[29].mxu0 }
 0x172   :  { %2199 = vmatprep.mubr.msk.f32.mxu1 %vm108_vm0, %v1618_v29 }
 0x173   :  { %2200 = vmatmul.mubr.msk.f32.vlgmr.msra.gmra.mrb[28].mxu1 %vm108_vm0, %v2187_v28 }
 0x174   :  { %v2190_v30 = vpop.f32.mrb[30].mxu0 }
 0x175   :  { %v1628_v31 = vpop.f32.mrb[31].mxu0 }
 0x176   :  { %2202 = vmatprep.mubr.msk.f32.mxu1 %vm108_vm0, %v1628_v31 }
 0x177   :  { %2203 = vmatmul.mubr.msk.f32.gmra.mrb[30].mxu1 %vm108_vm0, %v2190_v30 }
 0x20e   :  { %v2005_v24 = vpop.f32.mrb[0].mxu1 }
 0x20f   :  { %304 = vst.msk [vmem:[#allocation11 + $0x8] sm:$0xff] %vm108_vm0, %v2005_v24  ;;  %v284_v32 = vpop.f32.mrb[1].mxu1 }
 0x210   :  { %303 = vst.msk [vmem:[#allocation11] sm:$0xff] %vm108_vm0, %v284_v32 }
 0x212   :  { %v2008_v33 = vpop.f32.mrb[2].mxu1 }
 0x213   :  { %306 = vst.msk [vmem:[#allocation11 + $0x18] sm:$0xff] %vm108_vm0, %v2008_v33  ;;  %v294_v27 = vpop.f32.mrb[3].mxu1 }
 0x214   :  { %305 = vst.msk [vmem:[#allocation11 + $0x10] sm:$0xff] %vm108_vm0, %v294_v27 }
 0x216   :  { %v2033_v34 = vpop.f32.mrb[4].mxu1 }
 0x217   :  { %506 = vst.msk [vmem:[#allocation12 + $0x8] sm:$0xff] %vm108_vm0, %v2033_v34  ;;  %v486_v35 = vpop.f32.mrb[5].mxu1 }
 0x218   :  { %505 = vst.msk [vmem:[#allocation12] sm:$0xff] %vm108_vm0, %v486_v35 }
 0x21a   :  { %v2036_v36 = vpop.f32.mrb[6].mxu1 }
 0x21b   :  { %508 = vst.msk [vmem:[#allocation12 + $0x18] sm:$0xff] %vm108_vm0, %v2036_v36  ;;  %v496_v37 = vpop.f32.mrb[7].mxu1 }
 0x21c   :  { %507 = vst.msk [vmem:[#allocation12 + $0x10] sm:$0xff] %vm108_vm0, %v496_v37 }
 0x21e   :  { %v2061_v38 = vpop.f32.mrb[8].mxu1 }
 0x21f   :  { %702 = vrot.lane.b32.xlu0 %v2061_v38, %s2516_s4  ;;  %v677_v39 = vpop.f32.mrb[9].mxu1 }
 0x222   :  { %v2064_v40 = vpop.f32.mrb[10].mxu1 }
 0x223   :  { %700 = vrot.lane.b32.xlu0 %v677_v39, %s2516_s4  ;;  %706 = vrot.lane.b32.xlu1 %v2064_v40, %s2516_s4  ;;  %v687_v41 = vpop.f32.mrb[11].mxu1 }
 0x226   :  { %v2089_v42 = vpop.f32.mrb[12].mxu1 }
 0x227   :  { %704 = vrot.lane.b32.xlu1 %v687_v41, %s2516_s4  ;;  %v885_v43 = vpop.f32.mrb[13].mxu1 }
 0x228   :  { %908 = vrot.lane.b32.xlu0 %v885_v43, %s2516_s4 }
 0x22a   :  { %v2092_v44 = vpop.f32.mrb[14].mxu1 }
 0x22b   :  { %910 = vrot.lane.b32.xlu1 %v2089_v42, %s2516_s4  ;;  %v895_v45 = vpop.f32.mrb[15].mxu1 }
 0x22c   :  { %912 = vrot.lane.b32.xlu0 %v895_v45, %s2516_s4 }
 0x22e   :  { %v2117_v46 = vpop.f32.mrb[16].mxu1 }
 0x22f   :  { %914 = vrot.lane.b32.xlu1 %v2092_v44, %s2516_s4  ;;  %v1092_v47 = vpop.f32.mrb[17].mxu1 }
 0x230   :  { %1115 = vrot.lane.b32.xlu0 %v1092_v47, %s2517_s11 }
 0x232   :  { %v2120_v48 = vpop.f32.mrb[18].mxu1 }
 0x233   :  { %1117 = vrot.lane.b32.xlu1 %v2117_v46, %s2517_s11  ;;  %v1102_v49 = vpop.f32.mrb[19].mxu1 }
 0x234   :  { %1119 = vrot.lane.b32.xlu0 %v1102_v49, %s2517_s11 }
 0x236   :  { %v2145_v50 = vpop.f32.mrb[20].mxu1 }
 0x237   :  { %1121 = vrot.lane.b32.xlu1 %v2120_v48, %s2517_s11  ;;  %v1300_v51 = vpop.f32.mrb[21].mxu1 }
 0x238   :  { %1323 = vrot.lane.b32.xlu0 %v1300_v51, %s2517_s11 }
 0x23a   :  { %v2148_v52 = vpop.f32.mrb[22].mxu1 }
 0x23b   :  { %1325 = vrot.lane.b32.xlu1 %v2145_v50, %s2517_s11  ;;  %v1310_v53 = vpop.f32.mrb[23].mxu1 }
 0x23c   :  { %1327 = vrot.lane.b32.xlu0 %v1310_v53, %s2517_s11 }
 0x23e   :  { %v2173_v54 = vpop.f32.mrb[24].mxu1 }
 0x23f   :  { %1329 = vrot.lane.b32.xlu1 %v2148_v52, %s2517_s11  ;;  %v1507_v55 = vpop.f32.mrb[25].mxu1 }
 0x240   :  { %1530 = vrot.lane.b32.xlu0 %v1507_v55, %s2518_s3 }
 0x242   :  { %v2176_v56 = vpop.f32.mrb[26].mxu1 }
 0x243   :  { %1532 = vrot.lane.b32.xlu1 %v2173_v54, %s2518_s3  ;;  %v1517_v57 = vpop.f32.mrb[27].mxu1 }
 0x244   :  { %1534 = vrot.lane.b32.xlu0 %v1517_v57, %s2518_s3 }
 0x246   :  { %v2201_v58 = vpop.f32.mrb[28].mxu1 }
 0x247   :  { %1536 = vrot.lane.b32.xlu1 %v2176_v56, %s2518_s3  ;;  %v1715_v59 = vpop.f32.mrb[29].mxu1 }
 0x248   :  { %1738 = vrot.lane.b32.xlu0 %v1715_v59, %s2518_s3 }
 0x24a   :  { %v2204_v60 = vpop.f32.mrb[30].mxu1 }
 0x24b   :  { %1740 = vrot.lane.b32.xlu1 %v2201_v58, %s2518_s3  ;;  %v1725_v61 = vpop.f32.mrb[31].mxu1 }
 0x24c   :  { %1742 = vrot.lane.b32.xlu0 %v1725_v61, %s2518_s3 }
 0x24f   :  { %1744 = vrot.lane.b32.xlu1 %v2204_v60, %s2518_s3 }
 0x291   :  { %v703_v62 = vpop.permute.xlu0 %702 }
 0x292   :  { %714 = vst.msk [vmem:[#allocation11 + $0x8] sm:$0xff] %vm712_vm1, %v703_v62 }
 0x295   :  { %v701_v63 = vpop.permute.xlu0 %700  ;;  %v707_v0 = vpop.permute.xlu1 %706 }
 0x296   :  { %713 = vst.msk [vmem:[#allocation11] sm:$0xff] %vm712_vm1, %v701_v63  ;;  %716 = vst.msk [vmem:[#allocation11 + $0x18] sm:$0xff] %vm712_vm1, %v707_v0 }
 0x299   :  { %v705_v1 = vpop.permute.xlu1 %704 }
 0x29a   :  { %715 = vst.msk [vmem:[#allocation11 + $0x10] sm:$0xff] %vm712_vm1, %v705_v1  ;;  %v909_v2 = vpop.permute.xlu0 %908 }
 0x29b   :  { %920 = vst.msk [vmem:[#allocation12] sm:$0xff] %vm712_vm1, %v909_v2 }
 0x29d   :  { %v911_v3 = vpop.permute.xlu1 %910 }
 0x29e   :  { %921 = vst.msk [vmem:[#allocation12 + $0x8] sm:$0xff] %vm712_vm1, %v911_v3  ;;  %v913_v4 = vpop.permute.xlu0 %912 }
 0x29f   :  { %922 = vst.msk [vmem:[#allocation12 + $0x10] sm:$0xff] %vm712_vm1, %v913_v4 }
 0x2a1   :  { %v915_v5 = vpop.permute.xlu1 %914 }
 0x2a2   :  { %923 = vst.msk [vmem:[#allocation12 + $0x18] sm:$0xff] %vm712_vm1, %v915_v5  ;;  %v1116_v6 = vpop.permute.xlu0 %1115 }
 0x2a3   :  { %1128 = vst.msk [vmem:[#allocation11] sm:$0xff] %vm1127_vm2, %v1116_v6 }
 0x2a5   :  { %v1118_v7 = vpop.permute.xlu1 %1117 }
 0x2a6   :  { %1129 = vst.msk [vmem:[#allocation11 + $0x8] sm:$0xff] %vm1127_vm2, %v1118_v7  ;;  %v1120_v8 = vpop.permute.xlu0 %1119 }
 0x2a7   :  { %1130 = vst.msk [vmem:[#allocation11 + $0x10] sm:$0xff] %vm1127_vm2, %v1120_v8 }
 0x2a9   :  { %v1122_v9 = vpop.permute.xlu1 %1121 }
 0x2aa   :  { %1131 = vst.msk [vmem:[#allocation11 + $0x18] sm:$0xff] %vm1127_vm2, %v1122_v9  ;;  %v1324_v10 = vpop.permute.xlu0 %1323 }
 0x2ab   :  { %1335 = vst.msk [vmem:[#allocation12] sm:$0xff] %vm1127_vm2, %v1324_v10 }
 0x2ad   :  { %v1326_v11 = vpop.permute.xlu1 %1325 }
 0x2ae   :  { %1336 = vst.msk [vmem:[#allocation12 + $0x8] sm:$0xff] %vm1127_vm2, %v1326_v11  ;;  %v1328_v12 = vpop.permute.xlu0 %1327 }
 0x2af   :  { %1337 = vst.msk [vmem:[#allocation12 + $0x10] sm:$0xff] %vm1127_vm2, %v1328_v12 }
 0x2b1   :  { %v1330_v13 = vpop.permute.xlu1 %1329 }
 0x2b2   :  { %1338 = vst.msk [vmem:[#allocation12 + $0x18] sm:$0xff] %vm1127_vm2, %v1330_v13  ;;  %v1531_v14 = vpop.permute.xlu0 %1530 }
 0x2b3   :  { %1543 = vst.msk [vmem:[#allocation11] sm:$0xff] %vm1542_vm3, %v1531_v14 }
 0x2b5   :  { %v1533_v15 = vpop.permute.xlu1 %1532 }
 0x2b6   :  { %1544 = vst.msk [vmem:[#allocation11 + $0x8] sm:$0xff] %vm1542_vm3, %v1533_v15  ;;  %v1535_v16 = vpop.permute.xlu0 %1534 }
 0x2b7   :  { %1545 = vst.msk [vmem:[#allocation11 + $0x10] sm:$0xff] %vm1542_vm3, %v1535_v16 }
 0x2b9   :  { %v1537_v17 = vpop.permute.xlu1 %1536 }
 0x2ba   :  { %1546 = vst.msk [vmem:[#allocation11 + $0x18] sm:$0xff] %vm1542_vm3, %v1537_v17  ;;  %v1739_v18 = vpop.permute.xlu0 %1738 }
 0x2bb   :  { %1750 = vst.msk [vmem:[#allocation12] sm:$0xff] %vm1542_vm3, %v1739_v18 }
 0x2bc   :  { %2466 = shalt.err (!%p2463_p2)
}
 0x2bd   :  { %s2467_s16 = scalar_lea.hbm %s2860_s5, 512 }
 0x2be   :  { %p2468_p3 = scmp.ne.s32.totalorder %s2860_s5, %s2467_s16  ;;  %p2471_p4 = scmp.lt.u32.totalorder %s2467_s16, %s2860_s5 }
 0x2c0   :  { %p2473_p5 = pnand %p2471_p4, %p2468_p3 }
 0x2c2   :  { %2476 = shalt.err (!%p2473_p5)
}
 0x2c3   :  { %1765 = dma.vmem_to_hbm [thread:$0]  %s1760_s12, 512, %s2860_s5, [#allocation4], %s2511_s9, %s2511_s9, %s2512_s10   ;;  %v1741_v19 = vpop.permute.xlu1 %1740  ;;  %v1743_v20 = vpop.permute.xlu0 %1742 }
 0x2c4   :  { %s2520_s21 = smov [#allocation12]   ;;  %1751 = vst.msk [vmem:[#allocation12 + $0x8] sm:$0xff] %vm1542_vm3, %v1741_v19  ;;  %1752 = vst.msk [vmem:[#allocation12 + $0x10] sm:$0xff] %vm1542_vm3, %v1743_v20 }
 0x2c5   :  { %s1771_s22 = sshll.u32 %s2520_s21, 4  ;;  %s1772_s22 = int_to_ptr.vmem [resolvable:$true] %s1771_s22 }
 0x2c6   :  { %s2477_s23 = scalar_lea.vmem %s1772_s22, 512  ;;  %p2482_p7 = scmp.lt.s32.totalorder %s1772_s22, %s1772_s22 }
 0x2c7   :  { %v1745_v21 = vpop.permute.xlu1 %1744  ;;  %p2478_p6 = scmp.ne.s32.totalorder %s1772_s22, %s2477_s23  ;;  %p2483_p8 = scmp.lt.s32.totalorder %s2477_s23, %s2477_s23 }
 0x2c8   :  { %1753 = vst.msk [vmem:[#allocation12 + $0x18] sm:$0xff] %vm1542_vm3, %v1745_v21 }
 0x2c9   :  { %p2484_p9 = por %p2483_p8, %p2482_p7 }
 0x2cb   :  { %p2485_p10 = pnand %p2484_p9, %p2478_p6 }
 0x2cd   :  { %2488 = shalt.err (!%p2485_p10)
}
 0x2ce   :  { %s2489_s27 = scalar_lea.hbm %s2861_s6, 512 }
 0x2cf   :  { %p2490_p11 = scmp.ne.s32.totalorder %s2861_s6, %s2489_s27  ;;  %p2493_p12 = scmp.lt.u32.totalorder %s2489_s27, %s2861_s6 }
 0x2d1   :  { %p2495_p13 = pnand %p2493_p12, %p2490_p11 }
 0x2d3   :  { %2498 = shalt.err (!%p2495_p13)
}
 0x2d4   :  { %1777 = dma.vmem_to_hbm [thread:$0]  %s1772_s22, 512, %s2861_s6, [#allocation13], %s2511_s9, %s2511_s9, %s2512_s10  }
 0x2d5   :  { %2505 = dma.done.wait [#allocation4], 512  }
 0x2d6   :  { %2506 = vsyncadd [#allocation4], 4294966784 }
 0x2d7   :  { %2507 = dma.done.wait [#allocation13], 512  }
 0x2d8   :  { %2508 = vsyncadd [#allocation13], 4294966784 }
 0x2d9   :  { %1784 = vsyncpa [#allocation3], 1 }
 0x2da   :  { %1785 = vsyncpa [#allocation6], 1 }
 0x2db   :  { %1786 = vsyncpa [#allocation9], 1 }
 0x2dc   :  { %1787 = vsyncpa [#allocation4], 1 }
 0x2dd   :  { %1788 = vsyncpa [#allocation13], 1 }

</bundles_post_ra>
